<compile_context>
chip_gen: v7x
topology: tpu7x:2x2x1
jax: 0.10.0
libtpu: 0.0.40
codegen_flags: <defaults>
</compile_context>

<pallas_src>
import functools
import math

import numpy as np
import jax
import jax.numpy as jnp
from jax.experimental import pallas as pl
from jax.experimental.pallas import tpu as pltpu


# -----------------------------------------------------------------------------
# Small helpers
# -----------------------------------------------------------------------------
def _cdiv(a, b):
    return -(-a // b)


def _round_up(n, m):
    return ((n + m - 1) // m) * m


@functools.lru_cache(maxsize=1)
def _num_tensorcores():
    """Best-effort TensorCores-per-device count (v7x / megacore chips -> 2)."""
    try:
        info = pltpu.get_tpu_info()
        for attr in ("num_cores", "core_count", "num_tensorcores",
                     "tensorcores_per_chip", "num_cores_per_chip"):
            v = getattr(info, attr, None)
            if isinstance(v, int) and v > 0:
                return v
    except Exception:
        pass
    try:
        d = jax.devices()[0]
        v = getattr(d, "num_cores", None)
        if isinstance(v, int) and v > 0:
            return v
        kind = str(getattr(d, "device_kind", "")).lower()
        if ("v7" in kind) or ("v5p" in kind) or ("v4" in kind):
            return 2
    except Exception:
        pass
    return 1


def _sublane_multiple(itemsize):
    # f32 -> 8 sublanes, bf16 -> 16, int8/fp8 -> 32 (sublane-packing friendly tiles).
    return max(8, 32 // max(int(itemsize), 1))


def _choose_row_tile(rows, feat, itemsize, target_bytes=2 << 20):
    """Byte-targeted row tile: ~target_bytes per block to amortize the ~0.35us/step
    overhead, rounded to the dtype's sublane multiple, capped at 8 MiB so that
    double-buffered in+out blocks stay well inside v7x's 64 MiB physical VMEM."""
    target_bytes = int(min(max(int(target_bytes), 1 << 14), 8 << 20))
    sub = _sublane_multiple(itemsize)
    rows = max(int(rows), 1)
    rows_padded = _round_up(rows, sub)
    bytes_per_row = max(int(feat) * int(itemsize), 1)
    tile = (target_bytes // bytes_per_row) // sub * sub
    tile = max(tile, sub)
    if tile >= rows_padded:
        return rows_padded
    # Prefer a nearby evenly-dividing tile so the in-kernel ragged-row mask can be
    # dropped statically (bounded, trace-time-only search; never below tile/2).
    if rows % tile != 0:
        lo = max(sub, tile // 2, tile - 32 * sub)
        for t in range(tile, lo - 1, -sub):
            if rows % t == 0:
                return t
    return tile


def _lane_pack_factor(rows, feat):
    """If feat is not a multiple of 128 lanes, pack k consecutive rows into one
    lane-dense row of width k*feat (requires rows % k == 0)."""
    if feat % 128 == 0:
        return 1
    k = 128 // math.gcd(int(feat), 128)
    if k > 1 and rows >= k and rows % k == 0:
        return k
    return 1


def _compiler_params(dimension_semantics, block_bytes, live_blocks):
    # Double-buffered live blocks + headroom; clamp so the scoped VMEM request stays
    # inside v7x's 64 MiB physical VMEM (v5e/v6e have 128 MiB, so safe everywhere).
    need = 2 * int(live_blocks) * int(block_bytes) + (8 << 20)
    limit = int(min(max(need, 32 << 20), 56 << 20))
    return pltpu.CompilerParams(dimension_semantics=tuple(dimension_semantics),
                                vmem_limit_bytes=limit)


# -----------------------------------------------------------------------------
# Kernels
# -----------------------------------------------------------------------------
def _reduce_kernel(x_ref, sum_ref, sumsq_ref, *, rows, row_tile, steps_per_split, masked):
    """Accumulate per-feature sum(x) and sum(x^2) along the (arbitrary) row-step axis.
    Leading grid axis = per-TensorCore split; each split owns its own partial-sum block."""
    s = pl.program_id(1)

    @pl.when(s == 0)
    def _init():
        sum_ref[...] = jnp.zeros_like(sum_ref)
        sumsq_ref[...] = jnp.zeros_like(sumsq_ref)

    x = x_ref[...].astype(jnp.float32)
    if masked:
        # Only emitted when a ragged / redundant (clamped) tile can exist.
        c = pl.program_id(0)
        remaining = rows - (c * steps_per_split + s) * row_tile
        row_ids = jax.lax.broadcasted_iota(jnp.int32, (x.shape[0], 1), 0)
        x = jnp.where(row_ids < remaining, x, 0.0)

    sum_ref[...] += jnp.sum(x, axis=0, keepdims=True)
    sumsq_ref[...] += jnp.sum(x * x, axis=0, keepdims=True)


def _affine_kernel(x_ref, shift_ref, scale_ref, o_ref):
    """y = (x - shift) * scale  (forward: shift=mean, scale=1/std)."""
    x = x_ref[...].astype(jnp.float32)
    o_ref[...] = ((x - shift_ref[...]) * scale_ref[...]).astype(o_ref.dtype)


def _fused_kernel(x_ref, c_mean_ref, c_sq_ref, c_scale_ref, c_eps_ref,
                  y_ref, bsum_ref, bsumsq_ref):
    """Single-pass path (x VMEM-resident): batch sums, updated stats and normalize
    in one kernel.  c_mean = prev_sum/n_new, c_sq = prev_sum_sq/n_new,
    c_scale = gate/n_new (broadcast), c_eps = eps (broadcast)."""
    x = x_ref[...].astype(jnp.float32)
    bsum = jnp.sum(x, axis=0, keepdims=True)
    bsumsq = jnp.sum(x * x, axis=0, keepdims=True)
    mean = c_mean_ref[...] + c_scale_ref[...] * bsum        # (prev_sum + gate*bsum)/n_new
    ex2 = c_sq_ref[...] + c_scale_ref[...] * bsumsq          # (prev_sq + gate*bsumsq)/n_new
    var = jnp.maximum(ex2 - mean * mean, 0.0)                # clamp f32 cancellation
    inv_std = 1.0 / jnp.maximum(jnp.sqrt(var), c_eps_ref[...])
    y_ref[...] = ((x - mean) * inv_std).astype(y_ref.dtype)
    bsum_ref[...] = bsum
    bsumsq_ref[...] = bsumsq


# -----------------------------------------------------------------------------
# pallas_call wrappers
# -----------------------------------------------------------------------------
def _batch_sums(x2d, tile, n_split):
    """Pass 1: per-feature (sum, sum of squares) over all rows, both (feat,) f32."""
    rows, feat = x2d.shape
    nblocks = _cdiv(rows, tile)
    n_split = max(1, min(int(n_split), nblocks))
    steps = _cdiv(nblocks, n_split)
    masked = (rows % tile != 0) or (n_split * steps != nblocks)
    kernel = functools.partial(_reduce_kernel, rows=rows, row_tile=tile,
                               steps_per_split=steps, masked=masked)

    def x_map(c, s):
        # Clamp so redundant trailing steps (odd block count split two ways) just
        # re-read the last block; their contribution is masked to zero in-kernel.
        return (jnp.minimum(c * steps + s, nblocks - 1), 0)

    block_bytes = tile * feat * x2d.dtype.itemsize
    s_out, ss_out = pl.pallas_call(
        kernel,
        out_shape=(jax.ShapeDtypeStruct((n_split, 1, feat), jnp.float32),
                   jax.ShapeDtypeStruct((n_split, 1, feat), jnp.float32)),
        grid_spec=pltpu.PrefetchScalarGridSpec(
            num_scalar_prefetch=0,
            grid=(n_split, steps),
            in_specs=[pl.BlockSpec((tile, feat), x_map)],
            out_specs=[pl.BlockSpec((None, 1, feat), lambda c, s: (c, 0, 0)),
                       pl.BlockSpec((None, 1, feat), lambda c, s: (c, 0, 0))],
        ),
        compiler_params=_compiler_params(("parallel", "arbitrary"), block_bytes, 1),
    )(x2d)
    # Tiny O(n_split * feat) cross-split combine.
    return s_out[:, 0, :].sum(axis=0), ss_out[:, 0, :].sum(axis=0)


def _apply_affine(x2d, shift, scale, tile, out_dtype):
    """Pass 2: y = (x - shift) * scale, rows tiled on a parallel grid axis."""
    rows, feat = x2d.shape
    grid = (_cdiv(rows, tile),)
    block_bytes = tile * feat * max(x2d.dtype.itemsize, jnp.dtype(out_dtype).itemsize)
    return pl.pallas_call(
        _affine_kernel,
        out_shape=jax.ShapeDtypeStruct((rows, feat), out_dtype),
        grid_spec=pltpu.PrefetchScalarGridSpec(
            num_scalar_prefetch=0,
            grid=grid,
            in_specs=[pl.BlockSpec((tile, feat), lambda i: (i, 0)),
                      pl.BlockSpec((1, feat), lambda i: (0, 0)),
                      pl.BlockSpec((1, feat), lambda i: (0, 0))],
            out_specs=pl.BlockSpec((tile, feat), lambda i: (i, 0)),
        ),
        compiler_params=_compiler_params(("parallel",), block_bytes, 2),
    )(x2d,
      shift.reshape(1, feat).astype(jnp.float32),
      scale.reshape(1, feat).astype(jnp.float32))


def _fused_forward(x2d, running_sum, running_sum_sq, n_prev, gate, eps, out_dtype):
    """Fused single pallas_call: returns (y2d, batch_sum, batch_sumsq)."""
    rows, feat = x2d.shape
    n_new = jnp.maximum(n_prev + gate * jnp.float32(rows), 1.0)
    c_mean = (running_sum.reshape(1, feat) / n_new).astype(jnp.float32)
    c_sq = (running_sum_sq.reshape(1, feat) / n_new).astype(jnp.float32)
    c_scale = jnp.broadcast_to(gate / n_new, (1, feat)).astype(jnp.float32)
    c_eps = jnp.full((1, feat), eps, jnp.float32)
    block_bytes = rows * feat * 4
    y, bsum, bsumsq = pl.pallas_call(
        _fused_kernel,
        out_shape=(jax.ShapeDtypeStruct((rows, feat), out_dtype),
                   jax.ShapeDtypeStruct((1, feat), jnp.float32),
                   jax.ShapeDtypeStruct((1, feat), jnp.float32)),
        grid_spec=pltpu.PrefetchScalarGridSpec(
            num_scalar_prefetch=0,
            grid=(1,),
            in_specs=[pl.BlockSpec((rows, feat), lambda i: (0, 0)),
                      pl.BlockSpec((1, feat), lambda i: (0, 0)),
                      pl.BlockSpec((1, feat), lambda i: (0, 0)),
                      pl.BlockSpec((1, feat), lambda i: (0, 0)),
                      pl.BlockSpec((1, feat), lambda i: (0, 0))],
            out_specs=[pl.BlockSpec((rows, feat), lambda i: (0, 0)),
                       pl.BlockSpec((1, feat), lambda i: (0, 0)),
                       pl.BlockSpec((1, feat), lambda i: (0, 0))],
        ),
        compiler_params=_compiler_params(("arbitrary",), block_bytes, 2),
    )(x2d, c_mean, c_sq, c_scale, c_eps)
    return y, bsum[0], bsumsq[0]


def _normalize_affine(x2d, shift, scale, out_dtype, target_block_bytes):
    """Lane-packed wrapper around the affine kernel (y = (x - shift) * scale)."""
    rows, feat = x2d.shape
    k = _lane_pack_factor(rows, feat)
    if k > 1:
        xp = x2d.reshape(rows // k, k * feat)
        shift = jnp.tile(shift.reshape(feat), k)
        scale = jnp.tile(scale.reshape(feat), k)
    else:
        xp = x2d
        shift = shift.reshape(feat)
        scale = scale.reshape(feat)
    tile = _choose_row_tile(xp.shape[0], xp.shape[1], jnp.dtype(x2d.dtype).itemsize,
                            target_block_bytes)
    yp = _apply_affine(xp, shift, scale, tile, out_dtype)
    return yp.reshape(rows, feat)


# -----------------------------------------------------------------------------
# Functional InvertableNorm
# -----------------------------------------------------------------------------
def init_invertable_norm(shape, eps=1e-8, max_accumulations=10 ** 6):
    shape = tuple(int(s) for s in shape)
    return dict(
        shape=shape,
        eps=float(eps),
        max_accumulations=int(max_accumulations),
        running_sum=jnp.zeros(shape, jnp.float32),
        running_sum_sq=jnp.zeros(shape, jnp.float32),
        # TODO(synk): torch uses int64 counters; int32 is sufficient for demo-scale counts
        # (JAX x64 is disabled by default).
        num_accum=jnp.zeros((), jnp.int32),
        accum_count=jnp.zeros((), jnp.int32),
    )


def invertable_norm_stats(state):
    n = jnp.maximum(state["num_accum"].astype(jnp.float32), 1.0)
    mean = state["running_sum"] / n
    # Single-pass E[x^2]-E[x]^2 can dip slightly negative in f32 -> clamp before sqrt.
    var = jnp.maximum(state["running_sum_sq"] / n - mean * mean, 0.0)
    std = jnp.maximum(jnp.sqrt(var), state["eps"])
    return mean, std


def invertable_norm_forward(x, state, *, frozen=False,
                            fuse_bytes_limit=2 << 20, target_block_bytes=2 << 20):
    shape = state["shape"]
    nd = len(shape)
    assert x.shape[x.ndim - nd:] == shape, f"Expected shape {shape}, got {x.shape}"
    batch_shape = x.shape[:x.ndim - nd]
    rows = int(np.prod(batch_shape)) if batch_shape else 1
    feat = int(np.prod(shape))
    x2d = x.reshape(rows, feat)
    itemsize = jnp.dtype(x.dtype).itemsize

    if frozen:
        # `frozen` is a static Python bool: skip the reduction pass entirely
        # (2N HBM bytes instead of 3N) and normalize with the existing stats.
        mean, std = invertable_norm_stats(state)
        y2d = _normalize_affine(x2d, mean.reshape(feat), 1.0 / std.reshape(feat),
                                x.dtype, target_block_bytes)
        return y2d.reshape(x.shape), dict(state)

    do_accum = state["accum_count"] < state["max_accumulations"]
    gate = do_accum.astype(jnp.float32)

    y2d = None
    if rows * feat * itemsize <= int(fuse_bytes_limit) and feat % 128 == 0:
        # Fused single-pass path (x VMEM-resident): one HBM read of x instead of two.
        y2d, batch_sum, batch_sumsq = _fused_forward(
            x2d, state["running_sum"], state["running_sum_sq"],
            state["num_accum"].astype(jnp.float32), gate, state["eps"], x.dtype)
    else:
        # Two-pass path: streaming reduce (split across TensorCores when available),
        # then an affine pass with the updated stats.
        k = _lane_pack_factor(rows, feat)
        xp = x2d.reshape(rows // k, k * feat) if k > 1 else x2d
        tile = _choose_row_tile(xp.shape[0], xp.shape[1], itemsize, target_block_bytes)
        bsum_p, bsumsq_p = _batch_sums(xp, tile, _num_tensorcores())
        if k > 1:
            batch_sum = bsum_p.reshape(k, feat).sum(axis=0)
            batch_sumsq = bsumsq_p.reshape(k, feat).sum(axis=0)
        else:
            batch_sum, batch_sumsq = bsum_p, bsumsq_p

    new_state = dict(state)
    new_state["running_sum"] = state["running_sum"] + (gate * batch_sum).reshape(shape)
    new_state["running_sum_sq"] = state["running_sum_sq"] + (gate * batch_sumsq).reshape(shape)
    new_state["num_accum"] = state["num_accum"] + jnp.where(do_accum, rows, 0).astype(
        state["num_accum"].dtype)
    new_state["accum_count"] = state["accum_count"] + do_accum.astype(
        state["accum_count"].dtype)

    if y2d is None:
        mean, std = invertable_norm_stats(new_state)
        y2d = _normalize_affine(x2d, mean.reshape(feat), 1.0 / std.reshape(feat),
                                x.dtype, target_block_bytes)
    return y2d.reshape(x.shape), new_state


def invertable_norm_inverse(x, state, *, target_block_bytes=2 << 20):
    """x * std + mean, reusing the affine kernel via (x - (-mean/std)) * std."""
    shape = state["shape"]
    nd = len(shape)
    batch_shape = x.shape[:x.ndim - nd]
    rows = int(np.prod(batch_shape)) if batch_shape else 1
    feat = int(np.prod(shape))
    mean, std = invertable_norm_stats(state)
    mean = mean.reshape(feat)
    std = std.reshape(feat)
    y2d = _normalize_affine(x.reshape(rows, feat), -mean / std, std, x.dtype,
                            target_block_bytes)
    return y2d.reshape(x.shape)


# -----------------------------------------------------------------------------
# Pure-numpy reference with identical semantics (for sanity checks)
# -----------------------------------------------------------------------------
class _RefNorm:
    def __init__(self, shape, eps=1e-8, max_accumulations=10 ** 6):
        self.shape = tuple(shape)
        self.eps = eps
        self.max_accumulations = max_accumulations
        self.running_sum = np.zeros(self.shape, np.float64)
        self.running_sum_sq = np.zeros(self.shape, np.float64)
        self.num_accum = 0
        self.accum_count = 0

    def stats(self):
        n = max(self.num_accum, 1)
        mean = self.running_sum / n
        std = np.maximum(np.sqrt(self.running_sum_sq / n - mean ** 2), self.eps)
        return mean, std

    def forward(self, x, frozen=False):
        x = np.asarray(x, np.float64)
        batch_dims = tuple(range(x.ndim - len(self.shape)))
        if self.accum_count < self.max_accumulations and not frozen:
            self.running_sum += x.sum(axis=batch_dims)
            self.running_sum_sq += (x ** 2).sum(axis=batch_dims)
            self.num_accum += int(np.prod([x.shape[i] for i in batch_dims])) if batch_dims else 1
            self.accum_count += 1
        mean, std = self.stats()
        return (x - mean) / std


# -----------------------------------------------------------------------------
# Demo / self-test
# -----------------------------------------------------------------------------
if __name__ == "__main__":
    key = jax.random.PRNGKey(0)

    # --- case 1: feat (128,), fused single-pass path, two accumulating calls ---
    feat_shape = (128,)
    state = init_invertable_norm(feat_shape, eps=1e-8)
    ref = _RefNorm(feat_shape, eps=1e-8)

    key, k1, k2 = jax.random.split(key, 3)
    x1 = jax.random.normal(k1, (3, 128) + feat_shape, jnp.float32) * 2.0 + 0.5   # 384 rows
    x2 = jax.random.normal(k2, (50,) + feat_shape, jnp.float32) * 3.0 - 1.0      # 50 rows

    y1, state = invertable_norm_forward(x1, state)
    jax.block_until_ready(y1)
    y2, state = invertable_norm_forward(x2, state)
    jax.block_until_ready(y2)

    r1 = ref.forward(np.asarray(x1))
    r2 = ref.forward(np.asarray(x2))
    assert y1.shape == x1.shape and y2.shape == x2.shape
    assert float(np.max(np.abs(np.asarray(y1, np.float64) - r1))) < 2e-4
    assert float(np.max(np.abs(np.asarray(y2, np.float64) - r2))) < 2e-4
    assert int(state["num_accum"]) == ref.num_accum == 384 + 50
    assert int(state["accum_count"]) == ref.accum_count == 2

    # frozen forward: reduce pass is skipped entirely, state must not change
    y2f, state_f = invertable_norm_forward(x2, state, frozen=True)
    jax.block_until_ready(y2f)
    assert int(state_f["num_accum"]) == int(state["num_accum"])
    assert int(state_f["accum_count"]) == int(state["accum_count"])
    r2f = ref.forward(np.asarray(x2), frozen=True)
    assert float(np.max(np.abs(np.asarray(y2f, np.float64) - r2f))) < 2e-4

    # inverse round trip through the same affine kernel
    x2_rec = invertable_norm_inverse(y2f, state)
    jax.block_until_ready(x2_rec)
    assert float(np.max(np.abs(np.asarray(x2_rec) - np.asarray(x2)))) < 1e-3

    # --- case 2: forced two-pass path (tiled streaming reduce + affine, ragged tiles) ---
    state_tp = init_invertable_norm(feat_shape, eps=1e-8)
    ref_tp = _RefNorm(feat_shape, eps=1e-8)
    key, k4 = jax.random.split(key)
    x4 = jax.random.normal(k4, (200,) + feat_shape, jnp.float32) * 1.5 + 0.25
    y4, state_tp = invertable_norm_forward(x4, state_tp, fuse_bytes_limit=0,
                                           target_block_bytes=16 * 1024)
    jax.block_until_ready(y4)
    r4 = ref_tp.forward(np.asarray(x4))
    assert float(np.max(np.abs(np.asarray(y4, np.float64) - r4))) < 2e-4
    assert int(state_tp["num_accum"]) == ref_tp.num_accum == 200

    # --- case 3: small non-128 feature width (32) -> lane-packed two-pass path ---
    state_lp = init_invertable_norm((32,), eps=1e-8)
    ref_lp = _RefNorm((32,), eps=1e-8)
    key, k5 = jax.random.split(key)
    x5 = jax.random.normal(k5, (64, 32), jnp.float32) + 1.0
    y5, state_lp = invertable_norm_forward(x5, state_lp)
    jax.block_until_ready(y5)
    r5 = ref_lp.forward(np.asarray(x5))
    assert y5.shape == x5.shape
    assert float(np.max(np.abs(np.asarray(y5, np.float64) - r5))) < 2e-4

    # --- case 4: multi-dim feature shape (4, 32) (flattens to 128 lanes, fused) ---
    state_md = init_invertable_norm((4, 32), eps=1e-8)
    ref_md = _RefNorm((4, 32), eps=1e-8)
    key, k3 = jax.random.split(key)
    x3 = jax.random.normal(k3, (16, 4, 32), jnp.float32) + 2.0
    y3, state_md = invertable_norm_forward(x3, state_md)
    jax.block_until_ready(y3)
    r3 = ref_md.forward(np.asarray(x3))
    assert y3.shape == x3.shape
    assert float(np.max(np.abs(np.asarray(y3, np.float64) - r3))) < 2e-4

    # --- case 5: bf16 I/O (halves HBM bytes; stats stay f32) ---
    xb = x1.astype(jnp.bfloat16)
    yb, _ = invertable_norm_forward(xb, state, frozen=True)
    jax.block_until_ready(yb)
    rb = ref.forward(np.asarray(x1), frozen=True)
    assert yb.dtype == jnp.bfloat16
    assert float(np.max(np.abs(np.asarray(yb, np.float64) - rb))) < 1e-1

    print("KERNEL_OK")
</pallas_src>

<mosaic_0001>
module attributes {stable_mosaic.version = 11 : i64} {
  func.func @_fused_kernel(%arg0: i32, %arg1: memref<384x128xf32, #tpu.memory_space<vmem>>, %arg2: memref<1x128xf32, #tpu.memory_space<vmem>>, %arg3: memref<1x128xf32, #tpu.memory_space<vmem>>, %arg4: memref<1x128xf32, #tpu.memory_space<vmem>>, %arg5: memref<1x128xf32, #tpu.memory_space<vmem>>, %arg6: memref<384x128xf32, #tpu.memory_space<vmem>>, %arg7: memref<1x128xf32, #tpu.memory_space<vmem>>, %arg8: memref<1x128xf32, #tpu.memory_space<vmem>>) attributes {dimension_semantics = [#tpu.dimension_semantics<arbitrary>], iteration_bounds = array<i64: 1>, scalar_prefetch = 0 : i64, scratch_operands = 0 : i64, tpu.core_type = #tpu.core_type<tc>, window_params = [{pipeline_mode = #tpu.pipeline_mode<synchronous>, transform_indices = @transform_0, window_bounds = array<i64: 384, 128>}, {pipeline_mode = #tpu.pipeline_mode<synchronous>, transform_indices = @transform_1, window_bounds = array<i64: 1, 128>}, {pipeline_mode = #tpu.pipeline_mode<synchronous>, transform_indices = @transform_2, window_bounds = array<i64: 1, 128>}, {pipeline_mode = #tpu.pipeline_mode<synchronous>, transform_indices = @transform_3, window_bounds = array<i64: 1, 128>}, {pipeline_mode = #tpu.pipeline_mode<synchronous>, transform_indices = @transform_4, window_bounds = array<i64: 1, 128>}, {pipeline_mode = #tpu.pipeline_mode<synchronous>, transform_indices = @transform_5, window_bounds = array<i64: 384, 128>}, {pipeline_mode = #tpu.pipeline_mode<synchronous>, transform_indices = @transform_6, window_bounds = array<i64: 1, 128>}, {pipeline_mode = #tpu.pipeline_mode<synchronous>, transform_indices = @transform_7, window_bounds = array<i64: 1, 128>}]} {
    %c0 = arith.constant 0 : index
    %c0_0 = arith.constant 0 : index
    %0 = vector.load %arg1[%c0, %c0_0] : memref<384x128xf32, #tpu.memory_space<vmem>>, vector<384x128xf32>
    %cst = arith.constant dense<0.000000e+00> : vector<128xf32>
    %1 = vector.multi_reduction <add>, %0, %cst [0] : vector<384x128xf32> to vector<128xf32>
    %2 = vector.shape_cast %1 : vector<128xf32> to vector<1x128xf32>
    %3 = arith.mulf %0, %0 : vector<384x128xf32>
    %cst_1 = arith.constant dense<0.000000e+00> : vector<128xf32>
    %4 = vector.multi_reduction <add>, %3, %cst_1 [0] : vector<384x128xf32> to vector<128xf32>
    %5 = vector.shape_cast %4 : vector<128xf32> to vector<1x128xf32>
    %c0_2 = arith.constant 0 : index
    %c0_3 = arith.constant 0 : index
    %6 = vector.load %arg2[%c0_2, %c0_3] : memref<1x128xf32, #tpu.memory_space<vmem>>, vector<1x128xf32>
    %c0_4 = arith.constant 0 : index
    %c0_5 = arith.constant 0 : index
    %7 = vector.load %arg4[%c0_4, %c0_5] : memref<1x128xf32, #tpu.memory_space<vmem>>, vector<1x128xf32>
    %8 = arith.mulf %7, %2 : vector<1x128xf32>
    %9 = arith.addf %6, %8 : vector<1x128xf32>
    %c0_6 = arith.constant 0 : index
    %c0_7 = arith.constant 0 : index
    %10 = vector.load %arg3[%c0_6, %c0_7] : memref<1x128xf32, #tpu.memory_space<vmem>>, vector<1x128xf32>
    %c0_8 = arith.constant 0 : index
    %c0_9 = arith.constant 0 : index
    %11 = vector.load %arg4[%c0_8, %c0_9] : memref<1x128xf32, #tpu.memory_space<vmem>>, vector<1x128xf32>
    %12 = arith.mulf %11, %5 : vector<1x128xf32>
    %13 = arith.addf %10, %12 : vector<1x128xf32>
    %14 = arith.mulf %9, %9 : vector<1x128xf32>
    %15 = arith.subf %13, %14 : vector<1x128xf32>
    %cst_10 = arith.constant 0.000000e+00 : f32
    %16 = vector.broadcast %cst_10 : f32 to vector<1x128xf32>
    %17 = arith.maximumf %15, %16 : vector<1x128xf32>
    %18 = math.sqrt %17 : vector<1x128xf32>
    %c0_11 = arith.constant 0 : index
    %c0_12 = arith.constant 0 : index
    %19 = vector.load %arg5[%c0_11, %c0_12] : memref<1x128xf32, #tpu.memory_space<vmem>>, vector<1x128xf32>
    %20 = arith.maximumf %18, %19 : vector<1x128xf32>
    %cst_13 = arith.constant 1.000000e+00 : f32
    %21 = vector.broadcast %cst_13 : f32 to vector<1x128xf32>
    %22 = arith.divf %21, %20 : vector<1x128xf32>
    %23 = vector.broadcast %9 : vector<1x128xf32> to vector<384x128xf32>
    %24 = arith.subf %0, %23 : vector<384x128xf32>
    %25 = vector.broadcast %22 : vector<1x128xf32> to vector<384x128xf32>
    %26 = arith.mulf %24, %25 : vector<384x128xf32>
    %c0_14 = arith.constant 0 : index
    %c0_15 = arith.constant 0 : index
    %27 = vector.load %arg6[%c0_14, %c0_15] : memref<384x128xf32, #tpu.memory_space<vmem>>, vector<384x128xf32>
    tpu.vector_store %arg6[%c0_14, %c0_15], %26 {strides = array<i32>} : memref<384x128xf32, #tpu.memory_space<vmem>>, vector<384x128xf32>,
    %c0_16 = arith.constant 0 : index
    %c0_17 = arith.constant 0 : index
    %28 = vector.load %arg7[%c0_16, %c0_17] : memref<1x128xf32, #tpu.memory_space<vmem>>, vector<1x128xf32>
    tpu.vector_store %arg7[%c0_16, %c0_17], %2 {strides = array<i32>} : memref<1x128xf32, #tpu.memory_space<vmem>>, vector<1x128xf32>,
    %c0_18 = arith.constant 0 : index
    %c0_19 = arith.constant 0 : index
    %29 = vector.load %arg8[%c0_18, %c0_19] : memref<1x128xf32, #tpu.memory_space<vmem>>, vector<1x128xf32>
    tpu.vector_store %arg8[%c0_18, %c0_19], %5 {strides = array<i32>} : memref<1x128xf32, #tpu.memory_space<vmem>>, vector<1x128xf32>,
    return
  }
  func.func @transform_0(%arg0: i32) -> (i32, i32) {
    %c0_i32 = arith.constant 0 : i32
    %c0_i32_0 = arith.constant 0 : i32
    %c0_i32_1 = arith.constant 0 : i32
    return %c0_i32, %c0_i32_0 : i32, i32
  }
  func.func @transform_1(%arg0: i32) -> (i32, i32) {
    %c0_i32 = arith.constant 0 : i32
    %c0_i32_0 = arith.constant 0 : i32
    %c0_i32_1 = arith.constant 0 : i32
    return %c0_i32, %c0_i32_0 : i32, i32
  }
  func.func @transform_2(%arg0: i32) -> (i32, i32) {
    %c0_i32 = arith.constant 0 : i32
    %c0_i32_0 = arith.constant 0 : i32
    %c0_i32_1 = arith.constant 0 : i32
    return %c0_i32, %c0_i32_0 : i32, i32
  }
  func.func @transform_3(%arg0: i32) -> (i32, i32) {
    %c0_i32 = arith.constant 0 : i32
    %c0_i32_0 = arith.constant 0 : i32
    %c0_i32_1 = arith.constant 0 : i32
    return %c0_i32, %c0_i32_0 : i32, i32
  }
  func.func @transform_4(%arg0: i32) -> (i32, i32) {
    %c0_i32 = arith.constant 0 : i32
    %c0_i32_0 = arith.constant 0 : i32
    %c0_i32_1 = arith.constant 0 : i32
    return %c0_i32, %c0_i32_0 : i32, i32
  }
  func.func @transform_5(%arg0: i32) -> (i32, i32) {
    %c0_i32 = arith.constant 0 : i32
    %c0_i32_0 = arith.constant 0 : i32
    %c0_i32_1 = arith.constant 0 : i32
    return %c0_i32, %c0_i32_0 : i32, i32
  }
  func.func @transform_6(%arg0: i32) -> (i32, i32) {
    %c0_i32 = arith.constant 0 : i32
    %c0_i32_0 = arith.constant 0 : i32
    %c0_i32_1 = arith.constant 0 : i32
    return %c0_i32, %c0_i32_0 : i32, i32
  }
  func.func @transform_7(%arg0: i32) -> (i32, i32) {
    %c0_i32 = arith.constant 0 : i32
    %c0_i32_0 = arith.constant 0 : i32
    %c0_i32_1 = arith.constant 0 : i32
    return %c0_i32, %c0_i32_0 : i32, i32
  }
}

</mosaic_0001>

<bundles_post_ra>
// kernel: tpu_custom_call.1
= control target key start
LH: loop header
LB: loop body
LE: loop exit
PB: predicated region body
PF: predicated region fallthrough
CT: control target
= control target key end

     0   :  { %13 = vsyncpa [#allocation3], 0  ;;  %s1160_s0 = inlined_call_operand.hbm [shape: f32[384,128], index: 0, kind: input, shape index: {}]   ;;  %s1161_s1 = inlined_call_operand.vmem [shape: f32[1,128], index: 1, kind: input, shape index: {}]   ;;  %s1162_s2 = inlined_call_operand.vmem [shape: f32[1,128], index: 2, kind: input, shape index: {}]   ;;  %s1163_s3 = inlined_call_operand.vmem [shape: f32[1,128], index: 3, kind: input, shape index: {}]   ;;  %s1164_s4 = inlined_call_operand.vmem [shape: f32[1,128], index: 4, kind: input, shape index: {}]   ;;  %s1165_s5 = inlined_call_operand.hbm [shape: f32[384,128], index: 5, kind: output, shape index: {0}]   ;;  %s1166_s6 = inlined_call_operand.hbm [shape: f32[1,128], index: 6, kind: output, shape index: {1}]   ;;  %s1167_s7 = inlined_call_operand.hbm [shape: f32[1,128], index: 7, kind: output, shape index: {2}]  }
   0x1   :  { %14 = vsyncpa [#allocation4], 0 }
   0x2   :  { %15 = vsyncpa [#allocation7], 0  ;;  %s568_s24 = smov [#allocation2]   ;;  %s474_s28 = scalar_lea.hbm %s1160_s0, 6144 }
   0x3   :  { %s21_s25 = sshll.u32 %s568_s24, 4  ;;  %p475_p0 = scmp.ne.s32.totalorder %s1160_s0, %s474_s28  ;;  %s22_s25 = int_to_ptr.vmem [resolvable:$true] %s21_s25 }
   0x4   :  { %p478_p1 = scmp.lt.u32.totalorder %s474_s28, %s1160_s0 }
   0x6   :  { %p480_p2 = pnand %p478_p1, %p475_p0 }
   0x8   :  { %483 = shalt.err (!%p480_p2)
}
   0x9   :  { %s484_s10 = scalar_lea.vmem %s22_s25, 6144  ;;  %p489_p4 = scmp.lt.s32.totalorder %s22_s25, %s22_s25 }
   0xa   :  { %p485_p3 = scmp.ne.s32.totalorder %s22_s25, %s484_s10  ;;  %p490_p5 = scmp.lt.s32.totalorder %s484_s10, %s484_s10 }
   0xc   :  { %p491_p6 = por %p490_p5, %p489_p4 }
   0xe   :  { %p492_p7 = pnand %p491_p6, %p485_p3 }
  0x10   :  { %495 = shalt.err (!%p492_p7)
}
  0x11   :  { %s569_s11 = smov 128   ;;  %s570_s12 = smov 8  }
  0x12   :  { %27 = dma.hbm_to_vmem [thread:$0]  %s1160_s0, 6144, %s22_s25, [#allocation3], %s569_s11, %s569_s11, %s570_s12  }
  0x13   :  { %562 = dma.done.wait [#allocation3], 6144  }
  0x14   :  { %563 = vsyncadd [#allocation3], 4294961152  ;;  %v629_v0 = vld [vmem:[#allocation2] sm:$0xff]  ;;  %v631_v1 = vld [vmem:[#allocation2 + $0x8] sm:$0xff]  ;;  %s571_s0 = smov [#allocation6]   ;;  %s572_s18 = smov [#allocation8]  }
  0x15   :  { %v633_v2 = vld [vmem:[#allocation2 + $0x10] sm:$0xff]  ;;  %v635_v3 = vld [vmem:[#allocation2 + $0x18] sm:$0xff]  ;;  %v87_v4 = vadd.f32 %v631_v1, %v629_v0  ;;  %v140_v5 = vmul.f32 %v629_v0, %v629_v0  ;;  %v141_v6 = vmul.f32 %v631_v1, %v631_v1  ;;  %v645_v8 = vld [vmem:[#allocation2 + $0x20] sm:$0xff]  ;;  %s438_s15 = sshll.u32 %s571_s0, 4  ;;  %s448_s19 = sshll.u32 %s572_s18, 4  ;;  %s439_s15 = int_to_ptr.vmem [resolvable:$true] %s438_s15  ;;  %s875_s19 = int_to_ptr.vmem [resolvable:$true] %s448_s19 }
  0x16   :  { %v142_v7 = vmul.f32 %v633_v2, %v633_v2  ;;  %v143_v10 = vmul.f32 %v635_v3, %v635_v3  ;;  %v650_v12 = vld [vmem:[#allocation2 + $0x28] sm:$0xff]  ;;  %v144_v14 = vmul.f32 %v645_v8, %v645_v8  ;;  %v655_v16 = vld [vmem:[#allocation2 + $0x30] sm:$0xff]  ;;  %v660_v20 = vld [vmem:[#allocation2 + $0x38] sm:$0xff]  ;;  %s496_s22 = scalar_lea.vmem %s439_s15, 16  ;;  %s500_s23 = scalar_lea.vmem %s439_s15, 32 }
  0x17   :  { %v88_v9 = vadd.f32 %v87_v4, %v633_v2  ;;  %v188_v11 = vadd.f32 %v141_v6, %v140_v5  ;;  %v145_v18 = vmul.f32 %v650_v12, %v650_v12  ;;  %v146_v22 = vmul.f32 %v655_v16, %v655_v16  ;;  %v665_v24 = vld [vmem:[#allocation2 + $0x40] sm:$0xff]  ;;  %v670_v28 = vld [vmem:[#allocation2 + $0x48] sm:$0xff]  ;;  %v675_v32 = vld [vmem:[#allocation2 + $0x50] sm:$0xff]  ;;  %p497_p8 = scmp.ne.s32.totalorder %s439_s15, %s496_s22  ;;  %p501_p9 = scmp.lt.s32.totalorder %s439_s15, %s439_s15 }
  0x18   :  { %v147_v26 = vmul.f32 %v660_v20, %v660_v20  ;;  %v148_v30 = vmul.f32 %v665_v24, %v665_v24  ;;  %v149_v34 = vmul.f32 %v670_v28, %v670_v28  ;;  %v680_v36 = vld [vmem:[#allocation2 + $0x58] sm:$0xff]  ;;  %v150_v38 = vmul.f32 %v675_v32, %v675_v32  ;;  %v685_v40 = vld [vmem:[#allocation2 + $0x60] sm:$0xff]  ;;  %v690_v44 = vld [vmem:[#allocation2 + $0x68] sm:$0xff]  ;;  %p502_p10 = scmp.lt.s32.totalorder %s500_s23, %s496_s22 }
  0x19   :  { %v89_v13 = vadd.f32 %v88_v9, %v635_v3  ;;  %v189_v15 = vadd.f32 %v188_v11, %v142_v7  ;;  %v151_v42 = vmul.f32 %v680_v36, %v680_v36  ;;  %v152_v46 = vmul.f32 %v685_v40, %v685_v40  ;;  %v695_v48 = vld [vmem:[#allocation2 + $0x70] sm:$0xff]  ;;  %v700_v52 = vld [vmem:[#allocation2 + $0x78] sm:$0xff]  ;;  %v705_v56 = vld [vmem:[#allocation2 + $0x80] sm:$0xff] }
  0x1a   :  { %v153_v50 = vmul.f32 %v690_v44, %v690_v44  ;;  %v154_v54 = vmul.f32 %v695_v48, %v695_v48  ;;  %v155_v58 = vmul.f32 %v700_v52, %v700_v52  ;;  %v710_v60 = vld [vmem:[#allocation2 + $0x88] sm:$0xff]  ;;  %v156_v62 = vmul.f32 %v705_v56, %v705_v56  ;;  %v715_v4 = vld [vmem:[#allocation2 + $0x90] sm:$0xff]  ;;  %v720_v9 = vld [vmem:[#allocation2 + $0x98] sm:$0xff]  ;;  %p503_p11 = por %p502_p10, %p501_p9 }
  0x1b   :  { %v90_v17 = vadd.f32 %v89_v13, %v645_v8  ;;  %v190_v19 = vadd.f32 %v189_v15, %v143_v10  ;;  %v157_v6 = vmul.f32 %v710_v60, %v710_v60  ;;  %v158_v11 = vmul.f32 %v715_v4, %v715_v4 }
  0x1c   :  { %p504_p12 = pnand %p503_p11, %p497_p8 }
  0x1d   :  { %v91_v21 = vadd.f32 %v90_v17, %v650_v12  ;;  %v191_v23 = vadd.f32 %v190_v19, %v144_v14  ;;  %v725_v14 = vld [vmem:[#allocation2 + $0xa0] sm:$0xff]  ;;  %v159_v17 = vmul.f32 %v720_v9, %v720_v9  ;;  %v730_v19 = vld [vmem:[#allocation2 + $0xa8] sm:$0xff] }
  0x1f   :  { %v92_v25 = vadd.f32 %v91_v21, %v655_v16  ;;  %v192_v27 = vadd.f32 %v191_v23, %v145_v18 }
  0x21   :  { %v93_v29 = vadd.f32 %v92_v25, %v660_v20  ;;  %v193_v31 = vadd.f32 %v192_v27, %v146_v22  ;;  %v160_v22 = vmul.f32 %v725_v14, %v725_v14  ;;  %v735_v25 = vld [vmem:[#allocation2 + $0xb0] sm:$0xff]  ;;  %v161_v27 = vmul.f32 %v730_v19, %v730_v19 }
  0x23   :  { %v94_v33 = vadd.f32 %v93_v29, %v665_v24  ;;  %v194_v35 = vadd.f32 %v193_v31, %v147_v26 }
  0x25   :  { %v95_v37 = vadd.f32 %v94_v33, %v670_v28  ;;  %v195_v39 = vadd.f32 %v194_v35, %v148_v30  ;;  %v740_v30 = vld [vmem:[#allocation2 + $0xb8] sm:$0xff]  ;;  %v162_v33 = vmul.f32 %v735_v25, %v735_v25  ;;  %v745_v35 = vld [vmem:[#allocation2 + $0xc0] sm:$0xff] }
  0x27   :  { %v96_v41 = vadd.f32 %v95_v37, %v675_v32  ;;  %v196_v43 = vadd.f32 %v195_v39, %v149_v34 }
  0x29   :  { %v97_v45 = vadd.f32 %v96_v41, %v680_v36  ;;  %v197_v47 = vadd.f32 %v196_v43, %v150_v38  ;;  %v163_v38 = vmul.f32 %v740_v30, %v740_v30  ;;  %v750_v41 = vld [vmem:[#allocation2 + $0xc8] sm:$0xff]  ;;  %v164_v43 = vmul.f32 %v745_v35, %v745_v35 }
  0x2b   :  { %v98_v49 = vadd.f32 %v97_v45, %v685_v40  ;;  %v198_v51 = vadd.f32 %v197_v47, %v151_v42 }
  0x2d   :  { %v99_v53 = vadd.f32 %v98_v49, %v690_v44  ;;  %v199_v55 = vadd.f32 %v198_v51, %v152_v46  ;;  %v755_v46 = vld [vmem:[#allocation2 + $0xd0] sm:$0xff]  ;;  %v165_v49 = vmul.f32 %v750_v41, %v750_v41  ;;  %v760_v51 = vld [vmem:[#allocation2 + $0xd8] sm:$0xff] }
  0x2f   :  { %v100_v57 = vadd.f32 %v99_v53, %v695_v48  ;;  %v200_v59 = vadd.f32 %v199_v55, %v153_v50 }
  0x31   :  { %v101_v61 = vadd.f32 %v100_v57, %v700_v52  ;;  %v201_v63 = vadd.f32 %v200_v59, %v154_v54  ;;  %v166_v54 = vmul.f32 %v755_v46, %v755_v46  ;;  %v765_v57 = vld [vmem:[#allocation2 + $0xe0] sm:$0xff]  ;;  %v167_v59 = vmul.f32 %v760_v51, %v760_v51 }
  0x33   :  { %v102_v5 = vadd.f32 %v101_v61, %v705_v56  ;;  %v202_v7 = vadd.f32 %v201_v63, %v155_v58 }
  0x35   :  { %v103_v10 = vadd.f32 %v102_v5, %v710_v60  ;;  %v203_v13 = vadd.f32 %v202_v7, %v156_v62  ;;  %v770_v62 = vld [vmem:[#allocation2 + $0xe8] sm:$0xff]  ;;  %v168_v5 = vmul.f32 %v765_v57, %v765_v57  ;;  %v775_v7 = vld [vmem:[#allocation2 + $0xf0] sm:$0xff] }
  0x37   :  { %v104_v15 = vadd.f32 %v103_v10, %v715_v4  ;;  %v204_v18 = vadd.f32 %v203_v13, %v157_v6 }
  0x39   :  { %v105_v21 = vadd.f32 %v104_v15, %v720_v9  ;;  %v205_v23 = vadd.f32 %v204_v18, %v158_v11  ;;  %v169_v11 = vmul.f32 %v770_v62, %v770_v62  ;;  %v780_v15 = vld [vmem:[#allocation2 + $0xf8] sm:$0xff]  ;;  %v170_v18 = vmul.f32 %v775_v7, %v775_v7 }
  0x3b   :  { %v106_v26 = vadd.f32 %v105_v21, %v725_v14  ;;  %v206_v29 = vadd.f32 %v205_v23, %v159_v17 }
  0x3d   :  { %v107_v31 = vadd.f32 %v106_v26, %v730_v19  ;;  %v207_v34 = vadd.f32 %v206_v29, %v160_v22  ;;  %v785_v22 = vld [vmem:[#allocation2 + $0x100] sm:$0xff]  ;;  %v171_v26 = vmul.f32 %v780_v15, %v780_v15  ;;  %v790_v29 = vld [vmem:[#allocation2 + $0x108] sm:$0xff] }
  0x3f   :  { %v108_v37 = vadd.f32 %v107_v31, %v735_v25  ;;  %v208_v39 = vadd.f32 %v207_v34, %v161_v27 }
  0x41   :  { %v109_v42 = vadd.f32 %v108_v37, %v740_v30  ;;  %v209_v45 = vadd.f32 %v208_v39, %v162_v33  ;;  %v172_v33 = vmul.f32 %v785_v22, %v785_v22  ;;  %v795_v37 = vld [vmem:[#allocation2 + $0x110] sm:$0xff]  ;;  %v173_v39 = vmul.f32 %v790_v29, %v790_v29 }
  0x43   :  { %v110_v47 = vadd.f32 %v109_v42, %v745_v35  ;;  %v210_v50 = vadd.f32 %v209_v45, %v163_v38 }
  0x45   :  { %v111_v53 = vadd.f32 %v110_v47, %v750_v41  ;;  %v211_v55 = vadd.f32 %v210_v50, %v164_v43  ;;  %v800_v43 = vld [vmem:[#allocation2 + $0x118] sm:$0xff]  ;;  %v174_v47 = vmul.f32 %v795_v37, %v795_v37  ;;  %v805_v50 = vld [vmem:[#allocation2 + $0x120] sm:$0xff] }
  0x47   :  { %v112_v58 = vadd.f32 %v111_v53, %v755_v46  ;;  %v212_v61 = vadd.f32 %v211_v55, %v165_v49 }
  0x49   :  { %v113_v63 = vadd.f32 %v112_v58, %v760_v51  ;;  %v213_v6 = vadd.f32 %v212_v61, %v166_v54  ;;  %v175_v54 = vmul.f32 %v800_v43, %v800_v43  ;;  %v810_v58 = vld [vmem:[#allocation2 + $0x128] sm:$0xff]  ;;  %v176_v61 = vmul.f32 %v805_v50, %v805_v50 }
  0x4b   :  { %v114_v10 = vadd.f32 %v113_v63, %v765_v57  ;;  %v214_v13 = vadd.f32 %v213_v6, %v167_v59 }
  0x4d   :  { %v115_v17 = vadd.f32 %v114_v10, %v770_v62  ;;  %v215_v21 = vadd.f32 %v214_v13, %v168_v5  ;;  %v815_v5 = vld [vmem:[#allocation2 + $0x130] sm:$0xff]  ;;  %v177_v10 = vmul.f32 %v810_v58, %v810_v58  ;;  %v820_v13 = vld [vmem:[#allocation2 + $0x138] sm:$0xff] }
  0x4f   :  { %v116_v23 = vadd.f32 %v115_v17, %v775_v7  ;;  %v216_v27 = vadd.f32 %v215_v21, %v169_v11 }
  0x51   :  { %v117_v31 = vadd.f32 %v116_v23, %v780_v15  ;;  %v217_v34 = vadd.f32 %v216_v27, %v170_v18  ;;  %v178_v18 = vmul.f32 %v815_v5, %v815_v5  ;;  %v825_v23 = vld [vmem:[#allocation2 + $0x140] sm:$0xff]  ;;  %v179_v27 = vmul.f32 %v820_v13, %v820_v13 }
  0x53   :  { %v118_v38 = vadd.f32 %v117_v31, %v785_v22  ;;  %v218_v42 = vadd.f32 %v217_v34, %v171_v26 }
  0x55   :  { %v119_v45 = vadd.f32 %v118_v38, %v790_v29  ;;  %v219_v49 = vadd.f32 %v218_v42, %v172_v33  ;;  %v830_v33 = vld [vmem:[#allocation2 + $0x148] sm:$0xff]  ;;  %v180_v38 = vmul.f32 %v825_v23, %v825_v23  ;;  %v835_v42 = vld [vmem:[#allocation2 + $0x150] sm:$0xff] }
  0x57   :  { %v120_v53 = vadd.f32 %v119_v45, %v795_v37  ;;  %v220_v55 = vadd.f32 %v219_v49, %v173_v39 }
  0x59   :  { %v121_v59 = vadd.f32 %v120_v53, %v800_v43  ;;  %v221_v63 = vadd.f32 %v220_v55, %v174_v47  ;;  %v181_v47 = vmul.f32 %v830_v33, %v830_v33  ;;  %v840_v53 = vld [vmem:[#allocation2 + $0x158] sm:$0xff]  ;;  %v182_v55 = vmul.f32 %v835_v42, %v835_v42 }
  0x5a   :  { %1174 = vst [vmem:[#allocation12_spill] sm:$0xff] %v840_v53 }
  0x5b   :  { %v122_v6 = vadd.f32 %v121_v59, %v805_v50  ;;  %v222_v11 = vadd.f32 %v221_v63, %v175_v54 }
  0x5d   :  { %v123_v17 = vadd.f32 %v122_v6, %v810_v58  ;;  %v223_v21 = vadd.f32 %v222_v11, %v176_v61  ;;  %v845_v61 = vld [vmem:[#allocation2 + $0x160] sm:$0xff]  ;;  %v183_v6 = vmul.f32 %v840_v53, %v840_v53  ;;  %v850_v11 = vld [vmem:[#allocation2 + $0x168] sm:$0xff] }
  0x5e   :  { %1175 = vst [vmem:[#allocation13_spill] sm:$0xff] %v845_v61  ;;  %1176 = vst [vmem:[#allocation14_spill] sm:$0xff] %v850_v11 }
  0x5f   :  { %v124_v26 = vadd.f32 %v123_v17, %v815_v5  ;;  %v224_v31 = vadd.f32 %v223_v21, %v177_v10 }
  0x61   :  { %v125_v34 = vadd.f32 %v124_v26, %v820_v13  ;;  %v225_v39 = vadd.f32 %v224_v31, %v178_v18  ;;  %v184_v18 = vmul.f32 %v845_v61, %v845_v61  ;;  %v855_v26 = vld [vmem:[#allocation2 + $0x170] sm:$0xff]  ;;  %v185_v31 = vmul.f32 %v850_v11, %v850_v11 }
  0x63   :  { %v126_v45 = vadd.f32 %v125_v34, %v825_v23  ;;  %v226_v49 = vadd.f32 %v225_v39, %v179_v27 }
  0x65   :  { %v127_v54 = vadd.f32 %v126_v45, %v830_v33  ;;  %v227_v59 = vadd.f32 %v226_v49, %v180_v38  ;;  %v860_v38 = vld [vmem:[#allocation2 + $0x178] sm:$0xff]  ;;  %v186_v45 = vmul.f32 %v855_v26, %v855_v26 }
  0x67   :  { %v128_v63 = vadd.f32 %v127_v54, %v835_v42  ;;  %v228_v10 = vadd.f32 %v227_v59, %v181_v47  ;;  %v187_v54 = vmul.f32 %v860_v38, %v860_v38 }
  0x69   :  { %v129_v17 = vadd.f32 %v128_v63, %v840_v53  ;;  %v229_v21 = vadd.f32 %v228_v10, %v182_v55 }
  0x6b   :  { %v130_v27 = vadd.f32 %v129_v17, %v845_v61  ;;  %v230_v34 = vadd.f32 %v229_v21, %v183_v6 }
  0x6d   :  { %v131_v39 = vadd.f32 %v130_v27, %v850_v11  ;;  %v231_v47 = vadd.f32 %v230_v34, %v184_v18 }
  0x6f   :  { %v132_v49 = vadd.f32 %v131_v39, %v855_v26  ;;  %v232_v55 = vadd.f32 %v231_v47, %v185_v31  ;;  %v242_v39 = vld [vmem:[%s1163_s3] sm:$0x1] }
  0x70   :  { %v241_v47 = vld [vmem:[%s1161_s1] sm:$0x1] }
  0x71   :  { %v133_v59 = vadd.f32 %v132_v49, %v860_v38  ;;  %v233_v63 = vadd.f32 %v232_v55, %v186_v45 }
  0x73   :  { %v134_v10 = vrot.slane %v133_v59, 4  ;;  %v234_v17 = vadd.f32 %v233_v63, %v187_v54 }
  0x75   :  { %v135_v6 = vadd.f32 %v134_v10, %v133_v59  ;;  %v235_v21 = vrot.slane %v234_v17, 4 }
  0x77   :  { %v136_v61 = vrot.slane %v135_v6, 2  ;;  %v236_v53 = vadd.f32 %v235_v21, %v234_v17 }
  0x79   :  { %v137_v27 = vadd.f32 %v136_v61, %v135_v6  ;;  %v237_v11 = vrot.slane %v236_v53, 2 }
  0x7b   :  { %v138_v18 = vrot.slane %v137_v27, 1  ;;  %v238_v34 = vadd.f32 %v237_v11, %v236_v53 }
  0x7d   :  { %v139_v31 = vadd.f32 %v138_v18, %v137_v27  ;;  %v239_v45 = vrot.slane %v238_v34, 1 }
  0x7f   :  { %v243_v49 = vmul.f32 %v242_v39, %v139_v31  ;;  %418 = vst [vmem:[#allocation6] sm:$0x1] %v139_v31  ;;  %v240_v61 = vadd.f32 %v239_v45, %v238_v34 }
  0x80   :  { %507 = shalt.err (!%p504_p12)
}
  0x81   :  { %s508_s25 = scalar_lea.hbm %s1166_s6, 16 }
  0x82   :  { %p509_p13 = scmp.ne.s32.totalorder %s1166_s6, %s508_s25  ;;  %p512_p0 = scmp.lt.u32.totalorder %s508_s25, %s1166_s6 }
  0x84   :  { %p514_p1 = pnand %p512_p0, %p509_p13 }
  0x86   :  { %517 = shalt.err (!%p514_p1)
}
  0x87   :  { %441 = dma.vmem_to_hbm [thread:$0]  %s439_s15, 16, %s1166_s6, [#allocation7]   ;;  %v244_v53 = vadd.f32 %v243_v49, %v241_v47  ;;  %v245_v11 = vld [vmem:[%s1162_s2] sm:$0x1]  ;;  %v246_v54 = vmul.f32 %v242_v39, %v240_v61  ;;  %419 = vst [vmem:[#allocation8] sm:$0x1] %v240_v61 }
  0x88   :  { %s518_s10 = scalar_lea.vmem %s875_s19, 16  ;;  %s522_s13 = scalar_lea.vmem %s875_s19, 32 }
  0x89   :  { %v248_v55 = vmul.f32 %v244_v53, %v244_v53  ;;  %p519_p2 = scmp.ne.s32.totalorder %s875_s19, %s518_s10  ;;  %p523_p3 = scmp.lt.s32.totalorder %s875_s19, %s875_s19 }
  0x8a   :  { %p524_p4 = scmp.lt.s32.totalorder %s522_s13, %s518_s10 }
  0x8c   :  { %p525_p5 = por %p524_p4, %p523_p3 }
  0x8e   :  { %p526_p6 = pnand %p525_p5, %p519_p2 }
  0x90   :  { %529 = shalt.err (!%p526_p6)
}
  0x91   :  { %s530_s6 = scalar_lea.hbm %s1167_s7, 16 }
  0x92   :  { %p531_p7 = scmp.ne.s32.totalorder %s1167_s7, %s530_s6  ;;  %p534_p8 = scmp.lt.u32.totalorder %s530_s6, %s1167_s7 }
  0x94   :  { %p536_p9 = pnand %p534_p8, %p531_p7 }
  0x96   :  { %539 = shalt.err (!%p536_p9)
}
  0x97   :  { %451 = dma.vmem_to_hbm [thread:$0]  %s875_s19, 16, %s1167_s7, [#allocation7]   ;;  %v247_v59 = vadd.f32 %v246_v54, %v245_v11  ;;  %v263_v17 = vlaneseq  ;;  %v258_v39 = vld [vmem:[%s1164_s4] sm:$0x1] }
  0x98   :  { %s573_s4 = smov [#allocation5]  }
  0x99   :  { %v249_v63 = vsub.f32 %v247_v59, %v248_v55  ;;  %v264_v6 = vshrl.u32 %v263_v17, 7  ;;  %v1177_v17 = vld [vmem:[#allocation12_spill] sm:$0xff]  ;;  %s425_s7 = sshll.u32 %s573_s4, 4  ;;  %s426_s7 = int_to_ptr.vmem [resolvable:$true] %s425_s7 }
  0x9a   :  { %s540_s19 = scalar_lea.vmem %s426_s7, 6144  ;;  %p545_p11 = scmp.lt.s32.totalorder %s426_s7, %s426_s7 }
  0x9b   :  { %v250_v10 = vmax.f32 %v249_v63, 0.0  ;;  %v265_v21 = vsub.s32 0, %v264_v6  ;;  %p541_p10 = scmp.ne.s32.totalorder %s426_s7, %s540_s19  ;;  %p546_p12 = scmp.lt.s32.totalorder %s540_s19, %s540_s19 }
  0x9d   :  { %470 = vrsqrt.f32 %v250_v10  ;;  %vm253_vm0 = vcmp.eq.f32.partialorder %v250_v10, inf  ;;  %v256_v18 = vand.u32 2147483648, %v250_v10  ;;  %vm255_vm1 = vcmp.eq.f32.partialorder %v250_v10, 0.0  ;;  %p547_p13 = por %p546_p12, %p545_p11 }
  0x9e   :  { %v913_v45 = vrot.slane %v244_v53, %v265_v21 }
  0x9f   :  { %p548_p0 = pnand %p547_p13, %p541_p10 }
  0xa0   :  { %v268_v61 = vsub.f32 %v629_v0, %v913_v45  ;;  %v269_v11 = vsub.f32 %v631_v1, %v913_v45  ;;  %v270_v54 = vsub.f32 %v633_v2, %v913_v45  ;;  %v271_v55 = vsub.f32 %v635_v3, %v913_v45 }
  0xa1   :  { %v272_v59 = vsub.f32 %v645_v8, %v913_v45  ;;  %v273_v53 = vsub.f32 %v650_v12, %v913_v45  ;;  %v274_v63 = vsub.f32 %v655_v16, %v913_v45  ;;  %v275_v0 = vsub.f32 %v660_v20, %v913_v45 }
  0xa2   :  { %v276_v1 = vsub.f32 %v665_v24, %v913_v45  ;;  %v277_v2 = vsub.f32 %v670_v28, %v913_v45  ;;  %v278_v3 = vsub.f32 %v675_v32, %v913_v45  ;;  %v279_v8 = vsub.f32 %v680_v36, %v913_v45 }
  0xa3   :  { %v280_v12 = vsub.f32 %v685_v40, %v913_v45  ;;  %v281_v16 = vsub.f32 %v690_v44, %v913_v45  ;;  %v282_v20 = vsub.f32 %v695_v48, %v913_v45  ;;  %v283_v24 = vsub.f32 %v700_v52, %v913_v45 }
  0xa4   :  { %v284_v28 = vsub.f32 %v705_v56, %v913_v45  ;;  %v285_v32 = vsub.f32 %v710_v60, %v913_v45  ;;  %v286_v36 = vsub.f32 %v715_v4, %v913_v45  ;;  %v287_v40 = vsub.f32 %v720_v9, %v913_v45  ;;  %v1179_v9 = vld [vmem:[#allocation14_spill] sm:$0xff] }
  0xa5   :  { %v288_v44 = vsub.f32 %v725_v14, %v913_v45  ;;  %v289_v48 = vsub.f32 %v730_v19, %v913_v45  ;;  %v290_v52 = vsub.f32 %v735_v25, %v913_v45  ;;  %v291_v56 = vsub.f32 %v740_v30, %v913_v45 }
  0xa6   :  { %v1180_v14 = vsub.f32 %v745_v35, %v913_v45  ;;  %v1184_v35 = vsub.f32 %v765_v57, %v913_v45  ;;  %v1188_v57 = vsub.f32 %v785_v22, %v913_v45  ;;  %v1192_v22 = vsub.f32 %v805_v50, %v913_v45 }
  0xa7   :  { %v471_v27 = vpop.eup %470  ;;  %v1196_v50 = vsub.f32 %v825_v23, %v913_v45 }
  0xa8   :  { %v252_v34 = vmul.f32 %v471_v27, %v250_v10 }
  0xaa   :  { %v254_v31 = vsel %vm253_vm0, %v250_v10, %v252_v34  ;;  %v1178_v10 = vld [vmem:[#allocation13_spill] sm:$0xff] }
  0xab   :  { %v257_v47 = vsel %vm255_vm1, %v256_v18, %v254_v31  ;;  %v1200_v23 = vsub.f32 %v1178_v10, %v913_v45 }
  0xac   :  { %v259_v49 = vmax.f32 %v257_v47, %v258_v39  ;;  %v314_v39 = vsub.f32 %v855_v26, %v913_v45 }
  0xae   :  { %472 = vrcp.f32 %v259_v49 }
  0xb8   :  { %v473_v6 = vpop.eup %472 }
  0xb9   :  { %v997_v31 = vrot.slane %v473_v6, %v265_v21  ;;  %v315_v21 = vsub.f32 %v860_v38, %v913_v45 }
  0xbb   :  { %v322_v6 = vmul.f32 %v997_v31, %v268_v61  ;;  %v323_v47 = vmul.f32 %v997_v31, %v269_v11  ;;  %v324_v49 = vmul.f32 %v997_v31, %v270_v54  ;;  %v325_v27 = vmul.f32 %v997_v31, %v271_v55 }
  0xbc   :  { %v326_v4 = vmul.f32 %v997_v31, %v272_v59  ;;  %v327_v18 = vmul.f32 %v997_v31, %v273_v53  ;;  %v328_v34 = vmul.f32 %v997_v31, %v274_v63  ;;  %v329_v60 = vmul.f32 %v997_v31, %v275_v0 }
  0xbd   :  { %370 = vst [vmem:[#allocation5] sm:$0xff] %v322_v6  ;;  %371 = vst [vmem:[#allocation5 + $0x8] sm:$0xff] %v323_v47  ;;  %v330_v61 = vmul.f32 %v997_v31, %v276_v1  ;;  %v331_v11 = vmul.f32 %v997_v31, %v277_v2  ;;  %v332_v54 = vmul.f32 %v997_v31, %v278_v3 }
  0xbe   :  { %372 = vst [vmem:[#allocation5 + $0x10] sm:$0xff] %v324_v49  ;;  %373 = vst [vmem:[#allocation5 + $0x18] sm:$0xff] %v325_v27  ;;  %v333_v55 = vmul.f32 %v997_v31, %v279_v8  ;;  %v334_v59 = vmul.f32 %v997_v31, %v280_v12  ;;  %v335_v53 = vmul.f32 %v997_v31, %v281_v16 }
  0xbf   :  { %374 = vst [vmem:[#allocation5 + $0x20] sm:$0xff] %v326_v4  ;;  %375 = vst [vmem:[#allocation5 + $0x28] sm:$0xff] %v327_v18  ;;  %v336_v63 = vmul.f32 %v997_v31, %v282_v20  ;;  %v337_v0 = vmul.f32 %v997_v31, %v283_v24  ;;  %v338_v1 = vmul.f32 %v997_v31, %v284_v28 }
  0xc0   :  { %376 = vst [vmem:[#allocation5 + $0x30] sm:$0xff] %v328_v34  ;;  %377 = vst [vmem:[#allocation5 + $0x38] sm:$0xff] %v329_v60  ;;  %v339_v2 = vmul.f32 %v997_v31, %v285_v32  ;;  %v340_v3 = vmul.f32 %v997_v31, %v286_v36  ;;  %v341_v8 = vmul.f32 %v997_v31, %v287_v40 }
  0xc1   :  { %378 = vst [vmem:[#allocation5 + $0x40] sm:$0xff] %v330_v61  ;;  %379 = vst [vmem:[#allocation5 + $0x48] sm:$0xff] %v331_v11  ;;  %v342_v12 = vmul.f32 %v997_v31, %v288_v44  ;;  %v343_v16 = vmul.f32 %v997_v31, %v289_v48  ;;  %v344_v20 = vmul.f32 %v997_v31, %v290_v52 }
  0xc2   :  { %380 = vst [vmem:[#allocation5 + $0x50] sm:$0xff] %v332_v54  ;;  %381 = vst [vmem:[#allocation5 + $0x58] sm:$0xff] %v333_v55  ;;  %v345_v24 = vmul.f32 %v997_v31, %v291_v56  ;;  %v346_v19 = vmul.f32 %v997_v31, %v1180_v14  ;;  %v1181_v28 = vsub.f32 %v750_v41, %v913_v45 }
  0xc3   :  { %382 = vst [vmem:[#allocation5 + $0x60] sm:$0xff] %v334_v59  ;;  %383 = vst [vmem:[#allocation5 + $0x68] sm:$0xff] %v335_v53  ;;  %v1182_v32 = vsub.f32 %v755_v46, %v913_v45  ;;  %v1183_v36 = vsub.f32 %v760_v51, %v913_v45  ;;  %v350_v41 = vmul.f32 %v997_v31, %v1184_v35 }
  0xc4   :  { %384 = vst [vmem:[#allocation5 + $0x70] sm:$0xff] %v336_v63  ;;  %385 = vst [vmem:[#allocation5 + $0x78] sm:$0xff] %v337_v0  ;;  %v347_v25 = vmul.f32 %v997_v31, %v1181_v28  ;;  %v1185_v44 = vsub.f32 %v770_v62, %v913_v45  ;;  %v1186_v48 = vsub.f32 %v775_v7, %v913_v45 }
  0xc5   :  { %386 = vst [vmem:[#allocation5 + $0x80] sm:$0xff] %v338_v1  ;;  %387 = vst [vmem:[#allocation5 + $0x88] sm:$0xff] %v339_v2  ;;  %v348_v30 = vmul.f32 %v997_v31, %v1182_v32  ;;  %v349_v40 = vmul.f32 %v997_v31, %v1183_v36  ;;  %v1187_v52 = vsub.f32 %v780_v15, %v913_v45 }
  0xc6   :  { %388 = vst [vmem:[#allocation5 + $0x90] sm:$0xff] %v340_v3  ;;  %389 = vst [vmem:[#allocation5 + $0x98] sm:$0xff] %v341_v8  ;;  %v351_v46 = vmul.f32 %v997_v31, %v1185_v44  ;;  %v352_v51 = vmul.f32 %v997_v31, %v1186_v48  ;;  %v354_v62 = vmul.f32 %v997_v31, %v1188_v57 }
  0xc7   :  { %390 = vst [vmem:[#allocation5 + $0xa0] sm:$0xff] %v342_v12  ;;  %391 = vst [vmem:[#allocation5 + $0xa8] sm:$0xff] %v343_v16  ;;  %v353_v56 = vmul.f32 %v997_v31, %v1187_v52  ;;  %v1189_v60 = vsub.f32 %v790_v29, %v913_v45  ;;  %v1190_v4 = vsub.f32 %v795_v37, %v913_v45 }
  0xc8   :  { %392 = vst [vmem:[#allocation5 + $0xb0] sm:$0xff] %v344_v20  ;;  %393 = vst [vmem:[#allocation5 + $0xb8] sm:$0xff] %v345_v24  ;;  %v1191_v27 = vsub.f32 %v800_v43, %v913_v45  ;;  %v358_v29 = vmul.f32 %v997_v31, %v1192_v22  ;;  %v1193_v37 = vsub.f32 %v810_v58, %v913_v45 }
  0xc9   :  { %394 = vst [vmem:[#allocation5 + $0xc0] sm:$0xff] %v346_v19  ;;  %395 = vst [vmem:[#allocation5 + $0xc8] sm:$0xff] %v347_v25  ;;  %v355_v7 = vmul.f32 %v997_v31, %v1189_v60  ;;  %v356_v15 = vmul.f32 %v997_v31, %v1190_v4  ;;  %v1194_v43 = vsub.f32 %v815_v5, %v913_v45 }
  0xca   :  { %396 = vst [vmem:[#allocation5 + $0xd0] sm:$0xff] %v348_v30  ;;  %397 = vst [vmem:[#allocation5 + $0xd8] sm:$0xff] %v349_v40  ;;  %v357_v18 = vmul.f32 %v997_v31, %v1191_v27  ;;  %v359_v34 = vmul.f32 %v997_v31, %v1193_v37  ;;  %v1195_v49 = vsub.f32 %v820_v13, %v913_v45 }
  0xcb   :  { %398 = vst [vmem:[#allocation5 + $0xe0] sm:$0xff] %v350_v41  ;;  %399 = vst [vmem:[#allocation5 + $0xe8] sm:$0xff] %v351_v46  ;;  %v360_v47 = vmul.f32 %v997_v31, %v1194_v43  ;;  %v362_v58 = vmul.f32 %v997_v31, %v1196_v50  ;;  %v1197_v61 = vsub.f32 %v830_v33, %v913_v45 }
  0xcc   :  { %400 = vst [vmem:[#allocation5 + $0xf0] sm:$0xff] %v352_v51  ;;  %401 = vst [vmem:[#allocation5 + $0xf8] sm:$0xff] %v353_v56  ;;  %v361_v6 = vmul.f32 %v997_v31, %v1195_v49  ;;  %v1198_v11 = vsub.f32 %v835_v42, %v913_v45  ;;  %v1199_v54 = vsub.f32 %v1177_v17, %v913_v45 }
  0xcd   :  { %402 = vst [vmem:[#allocation5 + $0x100] sm:$0xff] %v354_v62  ;;  %403 = vst [vmem:[#allocation5 + $0x108] sm:$0xff] %v355_v7  ;;  %v363_v5 = vmul.f32 %v997_v31, %v1197_v61  ;;  %v366_v33 = vmul.f32 %v997_v31, %v1200_v23  ;;  %v1201_v59 = vsub.f32 %v1179_v9, %v913_v45 }
  0xce   :  { %404 = vst [vmem:[#allocation5 + $0x110] sm:$0xff] %v356_v15  ;;  %405 = vst [vmem:[#allocation5 + $0x118] sm:$0xff] %v357_v18  ;;  %v364_v13 = vmul.f32 %v997_v31, %v1198_v11  ;;  %v365_v55 = vmul.f32 %v997_v31, %v1199_v54  ;;  %v368_v17 = vmul.f32 %v997_v31, %v314_v39 }
  0xcf   :  { %406 = vst [vmem:[#allocation5 + $0x120] sm:$0xff] %v358_v29  ;;  %407 = vst [vmem:[#allocation5 + $0x128] sm:$0xff] %v359_v34  ;;  %v367_v42 = vmul.f32 %v997_v31, %v1201_v59  ;;  %v369_v53 = vmul.f32 %v997_v31, %v315_v21 }
  0xd0   :  { %408 = vst [vmem:[#allocation5 + $0x130] sm:$0xff] %v360_v47  ;;  %409 = vst [vmem:[#allocation5 + $0x138] sm:$0xff] %v361_v6 }
  0xd1   :  { %410 = vst [vmem:[#allocation5 + $0x140] sm:$0xff] %v362_v58  ;;  %411 = vst [vmem:[#allocation5 + $0x148] sm:$0xff] %v363_v5 }
  0xd2   :  { %412 = vst [vmem:[#allocation5 + $0x150] sm:$0xff] %v364_v13  ;;  %413 = vst [vmem:[#allocation5 + $0x158] sm:$0xff] %v365_v55 }
  0xd3   :  { %414 = vst [vmem:[#allocation5 + $0x160] sm:$0xff] %v366_v33  ;;  %415 = vst [vmem:[#allocation5 + $0x168] sm:$0xff] %v367_v42 }
  0xd4   :  { %416 = vst [vmem:[#allocation5 + $0x170] sm:$0xff] %v368_v17  ;;  %417 = vst [vmem:[#allocation5 + $0x178] sm:$0xff] %v369_v53 }
  0xd5   :  { %551 = shalt.err (!%p548_p0)
}
  0xd6   :  { %s552_s24 = scalar_lea.hbm %s1165_s5, 6144 }
  0xd7   :  { %p553_p1 = scmp.ne.s32.totalorder %s1165_s5, %s552_s24  ;;  %p556_p2 = scmp.lt.u32.totalorder %s552_s24, %s1165_s5 }
  0xd9   :  { %p558_p3 = pnand %p556_p2, %p553_p1 }
  0xdb   :  { %561 = shalt.err (!%p558_p3)
}
  0xdc   :  { %431 = dma.vmem_to_hbm [thread:$0]  %s426_s7, 6144, %s1165_s5, [#allocation4], %s569_s11, %s569_s11, %s570_s12  }
  0xdd   :  { %564 = dma.done.wait [#allocation4], 6144  }
  0xde   :  { %565 = vsyncadd [#allocation4], 4294961152 }
  0xdf   :  { %566 = dma.done.wait [#allocation7], 32  }
  0xe0   :  { %567 = vsyncadd [#allocation7], 4294967264 }
  0xe1   :  { %461 = vsyncpa [#allocation3], 1 }
  0xe2   :  { %462 = vsyncpa [#allocation4], 1 }
  0xe3   :  { %463 = vsyncpa [#allocation7], 1 }

</bundles_post_ra>
